<compile_context>
chip_gen: v7x
topology: tpu7x:2x2x1
jax: 0.10.0
libtpu: 0.0.40
codegen_flags: <defaults>
</compile_context>

<pallas_src>
import jax
import jax.numpy as jnp
from jax.experimental import pallas as pl
from jax.experimental.pallas import tpu as pltpu

_LANE = 128
_SUBLANE = 8
_TILE_BYTES = 2 * 1024 * 1024  # target bytes per x tile (per pipeline buffer)


def _drop_path_kernel(x_ref, s_ref, o_ref):
    # x_ref/o_ref: (TB, TN) tile of the flattened input/output.
    # s_ref:       (TB, 1) per-sample scale in x.dtype; broadcasts over lanes (VPU).
    o_ref[...] = x_ref[...] * s_ref[...]


def _choose_tiles(batch: int, n_feat: int, itemsize: int):
    """Pick (TB, TN) tiles that are VMEM-bounded and layout-legal."""
    # Sublane tile matched to dtype packing: 8 (f32/f64), 16 (bf16/f16), 32 (int8).
    sub = _SUBLANE * max(1, 4 // itemsize)
    tb = batch if batch < sub else sub
    # Largest lane tile (multiple of 128) within the per-buffer byte budget.
    tn = max(_LANE, (_TILE_BYTES // (tb * itemsize)) // _LANE * _LANE)
    if n_feat <= tn:
        # Whole feature dim fits in one tile: use it exactly.  Legal even when
        # n_feat is not a multiple of 128 (block dim == full array dim) and
        # avoids any boundary masking.
        tn = n_feat
    return tb, tn


def drop_path(x, drop_prob: float = 0.0, training: bool = False,
              scale_by_keep: bool = True, *, key=None):
    """Functional DropPath matching the PyTorch reference semantics."""
    if drop_prob == 0.0 or not training:
        return x
    if key is None:
        raise ValueError("drop_path needs a PRNG key when training with drop_prob > 0")

    keep_prob = 1.0 - drop_prob
    orig_shape = x.shape
    batch = orig_shape[0]

    # Per-sample Bernoulli keep mask (glue: only B scalars), scaled like PyTorch
    # (division happens in x's dtype, no f32 round-trip inside the kernel).
    keep = jax.random.bernoulli(key, p=keep_prob, shape=(batch,)).astype(jnp.float32)
    if keep_prob > 0.0 and scale_by_keep:
        scale = keep / keep_prob
    else:
        scale = keep
    scale2d = scale.astype(x.dtype).reshape(batch, 1)

    # Flatten per-sample features (free metadata op for contiguous input).
    flat = x.reshape(batch, -1)
    n_feat = flat.shape[1]
    itemsize = jnp.dtype(x.dtype).itemsize

    tb, tn = _choose_tiles(batch, n_feat, itemsize)
    bi = pl.cdiv(batch, tb)
    fj = pl.cdiv(n_feat, tn)

    # Put the larger tile axis first so megacore sharding (both axes "parallel")
    # always has a non-trivial leading axis to split across TensorCores.
    if fj >= bi:
        grid = (fj, bi)
        x_spec = pl.BlockSpec((tb, tn), lambda j, i: (i, j))
        s_spec = pl.BlockSpec((tb, 1), lambda j, i: (i, 0))
        o_spec = pl.BlockSpec((tb, tn), lambda j, i: (i, j))
    else:
        grid = (bi, fj)
        x_spec = pl.BlockSpec((tb, tn), lambda i, j: (i, j))
        s_spec = pl.BlockSpec((tb, 1), lambda i, j: (i, 0))
        o_spec = pl.BlockSpec((tb, tn), lambda i, j: (i, j))

    cost = pl.CostEstimate(
        flops=batch * n_feat,
        transcendentals=0,
        bytes_accessed=2 * batch * n_feat * itemsize + batch * itemsize,
    )

    out = pl.pallas_call(
        _drop_path_kernel,
        out_shape=jax.ShapeDtypeStruct((batch, n_feat), x.dtype),
        grid=grid,
        in_specs=[x_spec, s_spec],
        out_specs=o_spec,
        compiler_params=pltpu.CompilerParams(
            dimension_semantics=("parallel", "parallel")),
        cost_estimate=cost,
    )(flat, scale2d)

    return out.reshape(orig_shape)


class DropPath:
    """Drop paths (Stochastic Depth) per sample (main path of residual blocks)."""

    def __init__(self, drop_prob: float = 0.0, scale_by_keep: bool = True):
        self.drop_prob = drop_prob
        self.scale_by_keep = scale_by_keep
        self.training = True

    def __call__(self, x, *, key=None):
        return drop_path(x, self.drop_prob, self.training, self.scale_by_keep, key=key)


if __name__ == "__main__":
    root = jax.random.PRNGKey(0)
    kx, km, kx2, km2, kx3, km3 = jax.random.split(root, 6)

    drop_prob = 0.25
    module = DropPath(drop_prob=drop_prob, scale_by_keep=True)

    # --- NCHW input, feature size a multiple of 128 (fast path, no masking) ---
    x = jax.random.normal(kx, (2, 4, 16, 16), dtype=jnp.float32)
    y = jax.block_until_ready(module(x, key=km))
    keep = jax.random.bernoulli(km, p=1.0 - drop_prob, shape=(x.shape[0],)).astype(jnp.float32)
    ref = x * (keep / (1.0 - drop_prob))[:, None, None, None]
    assert jnp.allclose(y, ref, atol=1e-6), "training-path mismatch"

    # --- ragged feature size (5*7*9 = 315, not a multiple of 128): no pad/slice ---
    x2 = jax.random.normal(kx2, (3, 5, 7, 9), dtype=jnp.float32)
    y2 = jax.block_until_ready(module(x2, key=km2))
    keep2 = jax.random.bernoulli(km2, p=1.0 - drop_prob, shape=(x2.shape[0],)).astype(jnp.float32)
    ref2 = x2 * (keep2 / (1.0 - drop_prob))[:, None, None, None]
    assert jnp.allclose(y2, ref2, atol=1e-6), "ragged training-path mismatch"

    # --- bf16 input exercises the dtype-packed sublane tile ---
    x3 = jax.random.normal(kx3, (4, 8, 8, 8), dtype=jnp.bfloat16)
    y3 = jax.block_until_ready(module(x3, key=km3))
    keep3 = jax.random.bernoulli(km3, p=1.0 - drop_prob, shape=(x3.shape[0],)).astype(jnp.float32)
    scale3 = (keep3 / (1.0 - drop_prob)).astype(jnp.bfloat16)
    ref3 = x3 * scale3[:, None, None, None]
    assert jnp.allclose(y3.astype(jnp.float32), ref3.astype(jnp.float32),
                        atol=1e-2), "bf16 training-path mismatch"

    # --- eval path is identity ---
    module.training = False
    y_eval = jax.block_until_ready(module(x, key=km))
    assert jnp.allclose(y_eval, x), "eval-path should be identity"

    print("KERNEL_OK")
</pallas_src>

<mosaic_0001>
module attributes {stable_mosaic.version = 11 : i64} {
  func.func @_drop_path_kernel(%arg0: i32, %arg1: i32, %arg2: memref<2x1024xf32, #tpu.memory_space<vmem>>, %arg3: memref<2x1xf32, #tpu.memory_space<vmem>>, %arg4: memref<2x1024xf32, #tpu.memory_space<vmem>>) attributes {dimension_semantics = [#tpu.dimension_semantics<parallel>, #tpu.dimension_semantics<parallel>], iteration_bounds = array<i64: 1, 1>, scalar_prefetch = 0 : i64, scratch_operands = 0 : i64, tpu.core_type = #tpu.core_type<tc>, window_params = [{transform_indices = @transform_0, window_bounds = array<i64: 2, 1024>}, {transform_indices = @transform_1, window_bounds = array<i64: 2, 1>}, {transform_indices = @transform_2, window_bounds = array<i64: 2, 1024>}]} {
    %c0 = arith.constant 0 : index
    %c0_0 = arith.constant 0 : index
    %0 = vector.load %arg2[%c0, %c0_0] : memref<2x1024xf32, #tpu.memory_space<vmem>>, vector<2x1024xf32>
    %c0_1 = arith.constant 0 : index
    %c0_2 = arith.constant 0 : index
    %1 = vector.load %arg3[%c0_1, %c0_2] : memref<2x1xf32, #tpu.memory_space<vmem>>, vector<2x1xf32>
    %2 = vector.broadcast %1 : vector<2x1xf32> to vector<2x1024xf32>
    %3 = arith.mulf %0, %2 : vector<2x1024xf32>
    %c0_3 = arith.constant 0 : index
    %c0_4 = arith.constant 0 : index
    %4 = vector.load %arg4[%c0_3, %c0_4] : memref<2x1024xf32, #tpu.memory_space<vmem>>, vector<2x1024xf32>
    tpu.vector_store %arg4[%c0_3, %c0_4], %3 {strides = array<i32>} : memref<2x1024xf32, #tpu.memory_space<vmem>>, vector<2x1024xf32>,
    return
  }
  func.func @transform_0(%arg0: i32, %arg1: i32) -> (i32, i32) {
    %c0_i32 = arith.constant 0 : i32
    return %arg1, %arg0 : i32, i32
  }
  func.func @transform_1(%arg0: i32, %arg1: i32) -> (i32, i32) {
    %c0_i32 = arith.constant 0 : i32
    %c0_i32_0 = arith.constant 0 : i32
    return %arg1, %c0_i32 : i32, i32
  }
  func.func @transform_2(%arg0: i32, %arg1: i32) -> (i32, i32) {
    %c0_i32 = arith.constant 0 : i32
    return %arg1, %arg0 : i32, i32
  }
}

</mosaic_0001>

<bundles_post_ra>
// kernel: tpu_custom_call.1
= control target key start
LH: loop header
LB: loop body
LE: loop exit
PB: predicated region body
PF: predicated region fallthrough
CT: control target
= control target key end

     0   :  { %7 = vsyncpa [#allocation3], 0  ;;  %s157_s0 = inlined_call_operand.hbm [shape: f32[2,1024], index: 0, kind: input, shape index: {}]   ;;  %s158_s1 = inlined_call_operand.vmem [shape: f32[2,1], index: 1, kind: input, shape index: {}]   ;;  %s159_s2 = inlined_call_operand.hbm [shape: f32[2,1024], index: 2, kind: output, shape index: {}]  }
   0x1   :  { %8 = vsyncpa [#allocation4], 0  ;;  %s111_s9 = smov [#allocation2]   ;;  %s63_s13 = scalar_lea.hbm %s157_s0, 256 }
   0x2   :  { %s15_s10 = sshll.u32 %s111_s9, 4  ;;  %p64_p0 = scmp.ne.s32.totalorder %s157_s0, %s63_s13  ;;  %s16_s10 = int_to_ptr.vmem [resolvable:$true] %s15_s10 }
   0x3   :  { %p67_p1 = scmp.lt.u32.totalorder %s63_s13, %s157_s0 }
   0x5   :  { %p69_p2 = pnand %p67_p1, %p64_p0 }
   0x7   :  { %72 = shalt.err (!%p69_p2)
}
   0x8   :  { %s73_s18 = scalar_lea.vmem %s16_s10, 256  ;;  %p78_p4 = scmp.lt.s32.totalorder %s16_s10, %s16_s10 }
   0x9   :  { %p74_p3 = scmp.ne.s32.totalorder %s16_s10, %s73_s18  ;;  %p79_p5 = scmp.lt.s32.totalorder %s73_s18, %s73_s18 }
   0xb   :  { %p80_p6 = por %p79_p5, %p78_p4 }
   0xd   :  { %p81_p7 = pnand %p80_p6, %p74_p3 }
   0xf   :  { %84 = shalt.err (!%p81_p7)
}
  0x10   :  { %18 = dma.hbm_to_vmem [thread:$0]  %s157_s0, 256, %s16_s10, [#allocation3]  }
  0x11   :  { %107 = dma.done.wait [#allocation3], 256  }
  0x12   :  { %108 = vsyncadd [#allocation3], 4294967040  ;;  %v112_v0 = vmov 0   ;;  %v26_v1 = vld [vmem:[%s158_s1] sm:$0x3]  ;;  %v34_v4 = vlaneseq  ;;  %v25_v10 = vld [vmem:[#allocation2 + $0x8] sm:$0xff] }
  0x13   :  { %62 = vset.pattern.permute.xlu0 %v112_v0  ;;  %v113_v2 = vmov 269488144   ;;  %v24_v9 = vld [vmem:[#allocation2] sm:$0xff]  ;;  %s114_s23 = smov [#allocation5]  }
  0x14   :  { %29 = vperm.xlu0 %62, %v26_v1   ;;  %v32_v3 = vunpack.c.l.s4 %v113_v2  ;;  %v35_v6 = vshrl.u32 %v34_v4, 7  ;;  %s49_s0 = sshll.u32 %s114_s23, 4  ;;  %s50_s0 = int_to_ptr.vmem [resolvable:$true] %s49_s0 }
  0x15   :  { %s85_s24 = scalar_lea.vmem %s50_s0, 256  ;;  %p90_p9 = scmp.lt.s32.totalorder %s50_s0, %s50_s0 }
  0x16   :  { %v33_v5 = vunpack.c.0.s8 %v32_v3  ;;  %p86_p8 = scmp.ne.s32.totalorder %s50_s0, %s85_s24  ;;  %p91_p10 = scmp.lt.s32.totalorder %s85_s24, %s85_s24 }
  0x18   :  { %v36_v7 = vsub.s32 %v33_v5, %v35_v6  ;;  %p92_p11 = por %p91_p10, %p90_p9 }
  0x1a   :  { %p93_p12 = pnand %p92_p11, %p86_p8 }
  0x93   :  { %v30_v8 = vpop.permute.xlu0 %29 }
  0x94   :  { %v37_v11 = vrot.slane %v30_v8, %v36_v7 }
  0x96   :  { %v39_v12 = vmul.f32 %v37_v11, %v24_v9  ;;  %v40_v13 = vmul.f32 %v37_v11, %v25_v10 }
  0x98   :  { %41 = vst [vmem:[#allocation5] sm:$0xff] %v39_v12  ;;  %42 = vst [vmem:[#allocation5 + $0x8] sm:$0xff] %v40_v13 }
  0x99   :  { %96 = shalt.err (!%p93_p12)
}
  0x9a   :  { %s97_s26 = scalar_lea.hbm %s159_s2, 256 }
  0x9b   :  { %p98_p13 = scmp.ne.s32.totalorder %s159_s2, %s97_s26  ;;  %p101_p0 = scmp.lt.u32.totalorder %s97_s26, %s159_s2 }
  0x9d   :  { %p103_p1 = pnand %p101_p0, %p98_p13 }
  0x9f   :  { %106 = shalt.err (!%p103_p1)
}
  0xa0   :  { %52 = dma.vmem_to_hbm [thread:$0]  %s50_s0, 256, %s159_s2, [#allocation4]  }
  0xa1   :  { %109 = dma.done.wait [#allocation4], 256  }
  0xa2   :  { %110 = vsyncadd [#allocation4], 4294967040 }
  0xa3   :  { %56 = vsyncpa [#allocation3], 1 }
  0xa4   :  { %57 = vsyncpa [#allocation4], 1 }

</bundles_post_ra>
